<compile_context>
chip_gen: v5e
topology: v5e:2x2
jax: 0.10.0
libtpu: 0.0.40
codegen_flags: <defaults>
</compile_context>

<pallas_src>
import functools

import jax
import jax.numpy as jnp
from jax.experimental import pallas as pl
from jax.experimental.pallas import tpu as pltpu


# ----------------------------------------------------------------------------
# Pallas kernel: exact GELU (0.5 * x * (1 + erf(x / sqrt(2)))), f32 math inside.
# ----------------------------------------------------------------------------
def _gelu_kernel(x_ref, o_ref):
    x = x_ref[...].astype(jnp.float32)
    inv_sqrt2 = jnp.float32(0.7071067811865476)
    y = 0.5 * x * (1.0 + jax.lax.erf(x * inv_sqrt2))
    o_ref[...] = y.astype(o_ref.dtype)


_LANES = 128
# 1024 rows x 128 lanes x 4 B = 512 KiB per f32 block; with double-buffered
# input + output that is ~2 MiB of VMEM -> safe on every TPU generation
# (v7x has only 64 MiB physical / 32 MiB default scoped VMEM).
_MAX_BLOCK_ROWS = 1024


@jax.jit
def pallas_gelu(x):
    """Elementwise exact GELU computed in a Pallas TPU kernel.

    Accepts any shape / float dtype; internally views the data as a lane-dense
    (rows, 128) slab and tiles it with large row-blocks.
    """
    orig_shape = x.shape
    orig_dtype = x.dtype

    flat = x.reshape(-1)
    n = flat.shape[0]

    # Pad only when the element count is not a multiple of 128 (rare for NN
    # shapes; the demo shape needs no pad, so no extra HBM pass).
    rem = n % _LANES
    padded = rem != 0
    if padded:
        flat = jnp.pad(flat, (0, _LANES - rem))

    rows = flat.shape[0] // _LANES
    x2 = flat.reshape(rows, _LANES)

    if rows <= _MAX_BLOCK_ROWS:
        # Small tensor: one block covering the full slab (full-array block
        # shapes are exempt from the (8,128) divisibility rule).
        block_rows = rows
    else:
        block_rows = _MAX_BLOCK_ROWS

    grid = (pl.cdiv(rows, block_rows),)

    itemsize = jnp.dtype(orig_dtype).itemsize
    cost = pl.CostEstimate(
        flops=4 * n,
        transcendentals=n,
        bytes_accessed=2 * n * itemsize,
    )

    out2 = pl.pallas_call(
        _gelu_kernel,
        out_shape=jax.ShapeDtypeStruct((rows, _LANES), orig_dtype),
        grid_spec=pl.GridSpec(
            grid=grid,
            in_specs=[pl.BlockSpec((block_rows, _LANES), lambda i: (i, 0))],
            out_specs=pl.BlockSpec((block_rows, _LANES), lambda i: (i, 0)),
        ),
        compiler_params=pltpu.CompilerParams(
            dimension_semantics=("parallel",),
            vmem_limit_bytes=32 << 20,
        ),
        cost_estimate=cost,
    )(x2)

    if padded:
        return out2.reshape(-1)[:n].reshape(orig_shape)
    return out2.reshape(orig_shape)


# ----------------------------------------------------------------------------
# ModuleWrap: exact semantics of the PyTorch module (a function wrapper).
# ----------------------------------------------------------------------------
class ModuleWrap:
    """
    Wrap a function into a module-like callable, with possible `*args` and `**kwargs`.

    forward(*args, **kwargs) == func(*self.args, *args, **self.kwargs, **kwargs)
    """

    def __init__(self, func, *args, **kwargs) -> None:
        self.func = func
        self.__name__ = f"ModuleWrap({getattr(func, '__name__', repr(func))})"
        self.args = args
        self.kwargs = kwargs

    def forward(self, *args, **kwargs):
        return self.func(*self.args, *args, **self.kwargs, **kwargs)

    # nn.Module.__call__ dispatches to forward; mirror that here.
    def __call__(self, *args, **kwargs):
        return self.forward(*args, **kwargs)

    def __repr__(self):
        return self.__name__


if __name__ == "__main__":
    key = jax.random.PRNGKey(0)

    # Concrete instantiation: ModuleWrap(gelu) (ModuleWrap itself has no params).
    module = ModuleWrap(pallas_gelu)

    # Small NCHW-style input consistent with typical wrapped elementwise usage.
    x = jax.random.normal(key, (2, 4, 16, 16), dtype=jnp.float32)
    y = jax.block_until_ready(module(x))
    y_ref = jax.nn.gelu(x, approximate=False)
    assert y.shape == x.shape and y.dtype == x.dtype
    assert jnp.allclose(y, y_ref, atol=1e-5, rtol=1e-5)

    # Exercise the multi-block path (rows > 1024, partial last block).
    x2 = jax.random.normal(jax.random.PRNGKey(1), (2, 4, 128, 160), dtype=jnp.float32)
    y2 = jax.block_until_ready(module(x2))
    y2_ref = jax.nn.gelu(x2, approximate=False)
    assert jnp.allclose(y2, y2_ref, atol=1e-5, rtol=1e-5)

    # Exercise bf16 (f32 math inside the kernel, downcast on store).
    xb = jax.random.normal(jax.random.PRNGKey(2), (2, 4, 16, 16), dtype=jnp.bfloat16)
    yb = jax.block_until_ready(module(xb))
    yb_ref = jax.nn.gelu(xb.astype(jnp.float32), approximate=False).astype(jnp.bfloat16)
    assert yb.dtype == jnp.bfloat16
    assert jnp.allclose(yb.astype(jnp.float32), yb_ref.astype(jnp.float32), atol=1e-2, rtol=1e-2)

    print("KERNEL_OK")
</pallas_src>

<mosaic_0001>
module attributes {stable_mosaic.version = 11 : i64} {
  func.func @_gelu_kernel(%arg0: i32, %arg1: memref<16x128xf32, #tpu.memory_space<vmem>>, %arg2: memref<16x128xf32, #tpu.memory_space<vmem>>) attributes {dimension_semantics = [#tpu.dimension_semantics<parallel>], iteration_bounds = array<i64: 1>, scalar_prefetch = 0 : i64, scratch_operands = 0 : i64, tpu.core_type = #tpu.core_type<tc>, window_params = [{transform_indices = @transform_0, window_bounds = array<i64: 16, 128>}, {transform_indices = @transform_1, window_bounds = array<i64: 16, 128>}]} {
    %c0 = arith.constant 0 : index
    %c0_0 = arith.constant 0 : index
    %0 = vector.load %arg1[%c0, %c0_0] : memref<16x128xf32, #tpu.memory_space<vmem>>, vector<16x128xf32>
    %cst = arith.constant 5.000000e-01 : f32
    %1 = vector.broadcast %cst : f32 to vector<16x128xf32>
    %2 = arith.mulf %1, %0 : vector<16x128xf32>
    %cst_1 = arith.constant 0.707106769 : f32
    %3 = vector.broadcast %cst_1 : f32 to vector<16x128xf32>
    %4 = arith.mulf %0, %3 : vector<16x128xf32>
    %5 = math.erf %4 : vector<16x128xf32>
    %cst_2 = arith.constant 1.000000e+00 : f32
    %6 = vector.broadcast %cst_2 : f32 to vector<16x128xf32>
    %7 = arith.addf %6, %5 : vector<16x128xf32>
    %8 = arith.mulf %2, %7 : vector<16x128xf32>
    %c0_3 = arith.constant 0 : index
    %c0_4 = arith.constant 0 : index
    %9 = vector.load %arg2[%c0_3, %c0_4] : memref<16x128xf32, #tpu.memory_space<vmem>>, vector<16x128xf32>
    tpu.vector_store %arg2[%c0_3, %c0_4], %8 {strides = array<i32>} : memref<16x128xf32, #tpu.memory_space<vmem>>, vector<16x128xf32>,
    return
  }
  func.func @transform_0(%arg0: i32) -> (i32, i32) {
    %c0_i32 = arith.constant 0 : i32
    %c0_i32_0 = arith.constant 0 : i32
    return %arg0, %c0_i32 : i32, i32
  }
  func.func @transform_1(%arg0: i32) -> (i32, i32) {
    %c0_i32 = arith.constant 0 : i32
    %c0_i32_0 = arith.constant 0 : i32
    return %arg0, %c0_i32 : i32, i32
  }
}

</mosaic_0001>

<bundles_post_ra>
// kernel: pallas_gelu.1
= control target key start
LH: loop header
LB: loop body
LE: loop exit
PB: predicated region body
PF: predicated region fallthrough
CT: control target
= control target key end

     0   :  { %s150_s0 = inlined_call_operand.vmem [shape: f32[16,128], index: 0, kind: input, shape index: {}]   ;;  %s151_s1 = inlined_call_operand.vmem [shape: f32[16,128], index: 1, kind: output, shape index: {}]  }
   0x1   :  { %v123_v0 = vld [vmem:[%s150_s0] sm:$0xff]  ;;  %v128_v1 = vld [vmem:[%s150_s0 + $0x8] sm:$0xff] }
   0x2   :  { %v131_v2 = vmul.f32 0.70710677, %v123_v0  ;;  %v134_v3 = vmul.f32 0.70710677, %v128_v1 }
   0x4   :  { %v14_v4 = vmul.f32 %v131_v2, %v131_v2  ;;  %v54_v5 = vmul.f32 %v134_v3, %v134_v3 }
   0x6   :  { %v15_v6 = vmin.f32 %v14_v4, 16.0  ;;  %v55_v7 = vmin.f32 %v54_v5, 16.0 }
   0x8   :  { %v16_v8 = vmul.f32 2.1237322e-06, %v15_v6  ;;  %v27_v9 = vmul.f32 3.8918573e-05, %v15_v6  ;;  %v56_v10 = vmul.f32 2.1237322e-06, %v55_v7 }
   0x9   :  { %v67_v11 = vmul.f32 3.8918573e-05, %v55_v7 }
   0xa   :  { %v17_v12 = vadd.f32 0.00028619796, %v16_v8  ;;  %v28_v13 = vadd.f32 0.001143296, %v27_v9  ;;  %v57_v14 = vadd.f32 0.00028619796, %v56_v10 }
   0xb   :  { %v68_v15 = vadd.f32 0.001143296, %v67_v11 }
   0xc   :  { %v18_v16 = vmul.f32 %v17_v12, %v15_v6  ;;  %v29_v17 = vmul.f32 %v28_v13, %v15_v6  ;;  %v58_v18 = vmul.f32 %v57_v14, %v55_v7  ;;  %v10_v12 = vmul.f32 0.5, %v123_v0 }
   0xd   :  { %v69_v19 = vmul.f32 %v68_v15, %v55_v7  ;;  %v11_v14 = vmul.f32 0.5, %v128_v1 }
   0xe   :  { %v19_v20 = vadd.f32 0.0036580483, %v18_v16  ;;  %v30_v21 = vadd.f32 0.014752088, %v29_v17  ;;  %v59_v22 = vadd.f32 0.0036580483, %v58_v18 }
   0xf   :  { %v70_v23 = vadd.f32 0.014752088, %v69_v19 }
  0x10   :  { %v20_v24 = vmul.f32 %v19_v20, %v15_v6  ;;  %v31_v25 = vmul.f32 %v30_v21, %v15_v6  ;;  %v60_v26 = vmul.f32 %v59_v22, %v55_v7 }
  0x11   :  { %v71_v27 = vmul.f32 %v70_v23, %v55_v7 }
  0x12   :  { %v32_v28 = vadd.f32 0.112945676, %v31_v25  ;;  %v21_v29 = vadd.f32 0.05243302, %v20_v24  ;;  %v61_v32 = vadd.f32 0.05243302, %v60_v26 }
  0x13   :  { %v72_v30 = vadd.f32 0.112945676, %v71_v27 }
  0x14   :  { %v33_v31 = vmul.f32 %v32_v28, %v15_v6  ;;  %v22_v35 = vmul.f32 %v21_v29, %v15_v6  ;;  %v62_v38 = vmul.f32 %v61_v32, %v55_v7 }
  0x15   :  { %v73_v33 = vmul.f32 %v72_v30, %v55_v7 }
  0x16   :  { %v34_v34 = vadd.f32 0.4994258, %v33_v31  ;;  %v23_v41 = vadd.f32 0.18741608, %v22_v35  ;;  %v63_v43 = vadd.f32 0.18741608, %v62_v38 }
  0x17   :  { %v74_v36 = vadd.f32 0.4994258, %v73_v33 }
  0x18   :  { %v35_v37 = vmul.f32 %v34_v34, %v15_v6  ;;  %v24_v44 = vmul.f32 %v23_v41, %v15_v6  ;;  %v64_v45 = vmul.f32 %v63_v43, %v55_v7 }
  0x19   :  { %v75_v39 = vmul.f32 %v74_v36, %v55_v7 }
  0x1a   :  { %v36_v40 = vadd.f32 1.0, %v35_v37  ;;  %v25_v48 = vadd.f32 1.1283791, %v24_v44  ;;  %v65_v51 = vadd.f32 1.1283791, %v64_v45 }
  0x1b   :  { %v76_v42 = vadd.f32 1.0, %v75_v39 }
  0x1c   :  { %106 = vrcp.f32 %v36_v40  ;;  %vm42_vm0 = vweird.f32 %v36_v40  ;;  %v48_v50 = vand.u32 2147483648, %v36_v40  ;;  %v46_v54 = vand.u32 2147483647, %v36_v40 }
  0x1d   :  { %108 = vrcp.f32 %v76_v42  ;;  %v88_v55 = vand.u32 2147483648, %v76_v42  ;;  %vm82_vm2 = vweird.f32 %v76_v42  ;;  %v86_v57 = vand.u32 2147483647, %v76_v42 }
  0x1e   :  { %v49_v59 = vor.u32 1.1754944e-38, %v48_v50  ;;  %v26_v61 = vmul.f32 %v25_v48, %v131_v2  ;;  %vm47_vm5 = vcmp.eq.f32.partialorder %v46_v54, 8.507059e+37  ;;  %v66_v4 = vmul.f32 %v65_v51, %v134_v3 }
  0x1f   :  { %v89_v63 = vor.u32 1.1754944e-38, %v88_v55  ;;  %vm87_vm7 = vcmp.eq.f32.partialorder %v86_v57, 8.507059e+37 }
  0x22   :  { %v107_v46 = vpop.eup %106 }
  0x23   :  { %v109_v47 = vpop.eup %108  ;;  %v38_v49 = vmul.f32 %v107_v46, %v36_v40  ;;  %vm43_vm1 = vweird.f32 %v107_v46 }
  0x24   :  { %v78_v52 = vmul.f32 %v109_v47, %v76_v42  ;;  %vm83_vm3 = vweird.f32 %v109_v47  ;;  %vm44_vm4 = vmor %vm42_vm0, %vm43_vm1 }
  0x25   :  { %v39_v53 = vsub.f32 1.0, %v38_v49  ;;  %vm84_vm6 = vmor %vm82_vm2, %vm83_vm3 }
  0x26   :  { %v79_v56 = vsub.f32 1.0, %v78_v52 }
  0x27   :  { %v40_v58 = vmul.f32 %v107_v46, %v39_v53 }
  0x28   :  { %v80_v60 = vmul.f32 %v109_v47, %v79_v56 }
  0x29   :  { %v41_v62 = vadd.f32 %v107_v46, %v40_v58 }
  0x2a   :  { %v81_v5 = vadd.f32 %v109_v47, %v80_v60 }
  0x2b   :  { %v45_v6 = vsel %vm44_vm4, %v107_v46, %v41_v62 }
  0x2c   :  { %v50_v7 = vsel %vm47_vm5, %v49_v59, %v45_v6  ;;  %v85_v8 = vsel %vm84_vm6, %v109_v47, %v81_v5 }
  0x2d   :  { %v51_v9 = vmul.f32 %v50_v7, %v26_v61  ;;  %v90_v10 = vsel %vm87_vm7, %v89_v63, %v85_v8 }
  0x2e   :  { %v91_v11 = vmul.f32 %v90_v10, %v66_v4 }
  0x2f   :  { %v104_v13 = vclamps-f32 %v51_v9, 1.0 }
  0x30   :  { %v105_v2 = vclamps-f32 %v91_v11, 1.0 }
  0x31   :  { %v94_v15 = vadd.f32 1.0, %v104_v13 }
  0x32   :  { %v95_v16 = vadd.f32 1.0, %v105_v2 }
  0x33   :  { %v96_v17 = vmul.f32 %v94_v15, %v10_v12 }
  0x34   :  { %v97_v18 = vmul.f32 %v95_v16, %v11_v14 }
  0x35   :  { %98 = vst [vmem:[%s151_s1] sm:$0xff] %v96_v17 }
  0x36   :  { %99 = vst [vmem:[%s151_s1 + $0x8] sm:$0xff] %v97_v18 }

</bundles_post_ra>
